<compile_context>
chip_gen: v6e
topology: v6e:2x2x1
jax: 0.10.0
libtpu: 0.0.40
codegen_flags: <defaults>
</compile_context>

<pallas_src>
import functools

import jax
import jax.numpy as jnp
import numpy as np
from jax.experimental import pallas as pl
from jax.experimental.pallas import tpu as pltpu


# ----------------------------- sizing helpers --------------------------------


def _vmem_limit_bytes():
    """Generation-aware scoped-VMEM budget (v5e/v6e: 128 MiB phys, v7x: 64 MiB)."""
    phys = 128 * 1024 * 1024
    try:
        info = pltpu.get_tpu_info()
        phys = int(getattr(info, "vmem_capacity_bytes", phys))
    except Exception:
        pass
    # leave ~25% headroom for compiler scratch, never request more than 100 MiB
    return max(16 * 1024 * 1024, min((phys * 3) // 4, 100 * 1024 * 1024))


_VMEM_LIMIT = _vmem_limit_bytes()
_TILE_BUDGET = _VMEM_LIMIT // 2  # what the tile choosers may spend on blocks


def _largest_divisor_tile(n, cap, mult):
    """Largest t <= cap dividing n with (t % mult == 0 or t == n); fallback n."""
    cap = int(max(1, min(cap, n)))
    for t in range(cap, 0, -1):
        if n % t == 0 and (t % mult == 0 or t == n):
            return t
    return n


def _row_tile(M, row_bytes, min_steps=8, max_tile=1024):
    """Row tile (second-minor) for matmul-style kernels: fits the VMEM budget,
    is a multiple of 8 (or the full dim) and keeps >= 2 (target 8) grid steps."""
    cap_budget = max(8, _TILE_BUDGET // max(row_bytes, 1))
    if M >= 8 * min_steps:
        cap_steps = max(8, M // min_steps)
    elif M >= 16:
        cap_steps = max(8, M // 2)
    else:
        cap_steps = M
    return _largest_divisor_tile(M, min(cap_budget, cap_steps, max_tile), 8)


def _batch_tile(N, row_bytes, min_steps=8, max_tile=1024):
    """Leading-dim tile for the attention kernel (no 8/128 constraint)."""
    cap_budget = max(1, _TILE_BUDGET // max(row_bytes, 1))
    if N >= 2 * min_steps:
        cap_steps = max(1, N // min_steps)
    elif N >= 2:
        cap_steps = max(1, N // 2)
    else:
        cap_steps = N
    return _largest_divisor_tile(N, min(cap_budget, cap_steps, max_tile), 1)


# ------------------------------ Pallas kernels -------------------------------


def _qkv_proj_kernel(xw_ref, xh_ref, xt_ref, ww_ref, wh_ref, wt_ref,
                     ow_ref, oh_ref, ot_ref):
    # Three lane-dense [tm, 3C] q|k|v projections (one per axial branch), each
    # from that branch's attended-axis-innermost view of x.  No bias (the torch
    # q/k/v Linears are bias-free).
    ow_ref[...] = jnp.dot(
        xw_ref[...], ww_ref[...], preferred_element_type=jnp.float32
    ).astype(ow_ref.dtype)
    oh_ref[...] = jnp.dot(
        xh_ref[...], wh_ref[...], preferred_element_type=jnp.float32
    ).astype(oh_ref.dtype)
    ot_ref[...] = jnp.dot(
        xt_ref[...], wt_ref[...], preferred_element_type=jnp.float32
    ).astype(ot_ref.dtype)


def fused_qkv_proj(x_w, x_h, x_t, w_w, w_h, w_t):
    """One kernel, three [M, 3C] outputs (per-branch packed q|k|v)."""
    M, C = x_w.shape
    C3 = w_w.shape[1]
    row_bytes = 2 * 4 * (3 * C + 3 * C3)  # double-buffered inputs + outputs / row
    tm = _row_tile(M, row_bytes)
    grid = (M // tm,)
    row = lambda i: (i, 0)
    full = lambda i: (0, 0)
    out_sds = jax.ShapeDtypeStruct((M, C3), x_w.dtype)
    return pl.pallas_call(
        _qkv_proj_kernel,
        out_shape=(out_sds, out_sds, out_sds),
        grid_spec=pltpu.PrefetchScalarGridSpec(
            num_scalar_prefetch=0,
            grid=grid,
            in_specs=[
                pl.BlockSpec((tm, C), row),
                pl.BlockSpec((tm, C), row),
                pl.BlockSpec((tm, C), row),
                pl.BlockSpec((C, C3), full),
                pl.BlockSpec((C, C3), full),
                pl.BlockSpec((C, C3), full),
            ],
            out_specs=[
                pl.BlockSpec((tm, C3), row),
                pl.BlockSpec((tm, C3), row),
                pl.BlockSpec((tm, C3), row),
            ],
        ),
        compiler_params=pltpu.CompilerParams(
            dimension_semantics=("parallel",),
            vmem_limit_bytes=_VMEM_LIMIT,
        ),
    )(x_w, x_h, x_t, w_w, w_h, w_t)


def _axial_mha_kernel(qkv_ref, o_ref, *, n_head, d_head, scale):
    """Multi-head attention on a packed [bn, L, 3C] q|k|v block (heads in-kernel)."""
    C = n_head * d_head
    for h in range(n_head):                                   # static head loop
        lo = h * d_head
        q = qkv_ref[:, :, lo:lo + d_head] * scale             # fold 1/sqrt(dk) into q
        k = qkv_ref[:, :, C + lo:C + lo + d_head]
        v = qkv_ref[:, :, 2 * C + lo:2 * C + lo + d_head]
        s = jnp.einsum("nld,nmd->nlm", q, k, preferred_element_type=jnp.float32)
        s = s - jnp.max(s, axis=-1, keepdims=True)
        p = jnp.exp(s)
        l = jnp.sum(p, axis=-1, keepdims=True)
        o = jnp.einsum("nlm,nmd->nld", p, v, preferred_element_type=jnp.float32)
        # exact softmax normalization (the approximate reciprocal failed the
        # correctness test); store the head straight into its lane window.
        o_ref[:, :, lo:lo + d_head] = (o / l).astype(o_ref.dtype)


def axial_attention_mh(qkv, *, n_head):
    """qkv: [N, L, 3C] packed q|k|v; returns attention output [N, L, C]."""
    N, L, C3 = qkv.shape
    C = C3 // 3
    d = C // n_head
    # per batch-row VMEM: double-buffered in/out blocks + f32 temps of one head
    row_bytes = 2 * 4 * (L * C3 + L * C) + 4 * (L * L + 3 * L * C)
    bn = _batch_tile(N, row_bytes)
    grid = (N // bn,)
    kern = functools.partial(
        _axial_mha_kernel, n_head=n_head, d_head=d, scale=1.0 / float(np.sqrt(d))
    )
    return pl.pallas_call(
        kern,
        out_shape=jax.ShapeDtypeStruct((N, L, C), qkv.dtype),
        grid_spec=pltpu.PrefetchScalarGridSpec(
            num_scalar_prefetch=0,
            grid=grid,
            in_specs=[pl.BlockSpec((bn, L, C3), lambda i: (i, 0, 0))],
            out_specs=pl.BlockSpec((bn, L, C), lambda i: (i, 0, 0)),
        ),
        compiler_params=pltpu.CompilerParams(
            dimension_semantics=("parallel",),
            vmem_limit_bytes=_VMEM_LIMIT,
        ),
    )(qkv)


def _fused_out_proj_kernel(aw_ref, ah_ref, at_ref, ww_ref, wh_ref, wt_ref,
                           b_ref, o_ref):
    acc = jnp.dot(aw_ref[...], ww_ref[...], preferred_element_type=jnp.float32)
    acc = acc + jnp.dot(ah_ref[...], wh_ref[...], preferred_element_type=jnp.float32)
    acc = acc + jnp.dot(at_ref[...], wt_ref[...], preferred_element_type=jnp.float32)
    o_ref[...] = (acc + b_ref[...].astype(jnp.float32)).astype(o_ref.dtype)


def fused_out_proj(a_w, a_h, a_t, w_w, w_h, w_t, b):
    """o = a_w@w_w + a_h@w_h + a_t@w_t + b — three fc's and the branch sum fused."""
    M, Ci = a_w.shape
    Co = w_w.shape[1]
    row_bytes = 2 * 4 * (3 * Ci + Co)
    tm = _row_tile(M, row_bytes)
    grid = (M // tm,)
    row = lambda i: (i, 0)
    full = lambda i: (0, 0)
    return pl.pallas_call(
        _fused_out_proj_kernel,
        out_shape=jax.ShapeDtypeStruct((M, Co), a_w.dtype),
        grid_spec=pltpu.PrefetchScalarGridSpec(
            num_scalar_prefetch=0,
            grid=grid,
            in_specs=[
                pl.BlockSpec((tm, Ci), row),
                pl.BlockSpec((tm, Ci), row),
                pl.BlockSpec((tm, Ci), row),
                pl.BlockSpec((Ci, Co), full),
                pl.BlockSpec((Ci, Co), full),
                pl.BlockSpec((Ci, Co), full),
                pl.BlockSpec((1, Co), full),
            ],
            out_specs=pl.BlockSpec((tm, Co), row),
        ),
        compiler_params=pltpu.CompilerParams(
            dimension_semantics=("parallel",),
            vmem_limit_bytes=_VMEM_LIMIT,
        ),
    )(a_w, a_h, a_t, w_w, w_h, w_t, b)


# ------------------------------- module glue ---------------------------------


def axial_block(x, P):
    """AxialBlock.forward. x: [B, C, T, H, W] -> [B, C, T, H, W]."""
    B, C, T, H, W = x.shape
    M = B * T * H * W
    nh = P["attn_w"]["n_head"]
    C3 = 3 * C

    # Branch-ordered channels-last views of x (C-wide XLA transposes only; the
    # 3C-wide qkv tensors are never transposed, and there are no slice copies).
    x_w = jnp.transpose(x, (0, 2, 3, 4, 1))  # [B,T,H,W,C]  attend over W
    x_h = jnp.transpose(x, (0, 2, 4, 3, 1))  # [B,T,W,H,C]  attend over H
    x_t = jnp.transpose(x, (0, 3, 4, 2, 1))  # [B,H,W,T,C]  attend over T

    # Per-branch fused q|k|v weights [C, 3C] (torch q/k/v Linears have no bias).
    wqkv = {
        n: jnp.concatenate([P[n]["wq"], P[n]["wk"], P[n]["wv"]], axis=1)
        for n in ("attn_w", "attn_h", "attn_t")
    }

    # One projection kernel, three lane-dense [M, 3C] outputs.
    qkv_w, qkv_h, qkv_t = fused_qkv_proj(
        x_w.reshape(M, C), x_h.reshape(M, C), x_t.reshape(M, C),
        wqkv["attn_w"], wqkv["attn_h"], wqkv["attn_t"],
    )

    # Axial attention: every branch already has its attended axis innermost, so
    # each kernel reads and writes fully contiguous blocks.
    a_w = axial_attention_mh(qkv_w.reshape(B * T * H, W, C3), n_head=nh)
    a_h = axial_attention_mh(qkv_h.reshape(B * T * W, H, C3), n_head=nh)
    a_t = axial_attention_mh(qkv_t.reshape(B * H * W, T, C3), n_head=nh)

    # Re-align H/T branch outputs to (B,T,H,W) row order (C-wide transposes).
    a_w = a_w.reshape(M, C)
    a_h = a_h.reshape(B, T, W, H, C).transpose(0, 1, 3, 2, 4).reshape(M, C)
    a_t = a_t.reshape(B, H, W, T, C).transpose(0, 3, 1, 2, 4).reshape(M, C)

    # Fused output projection + 3-branch sum (single summed bias).
    b_sum = P["attn_w"]["bfc"] + P["attn_h"]["bfc"] + P["attn_t"]["bfc"]
    y = fused_out_proj(
        a_w, a_h, a_t,
        P["attn_w"]["wfc"], P["attn_h"]["wfc"], P["attn_t"]["wfc"],
        b_sum,
    )
    return jnp.transpose(y.reshape(B, T, H, W, C), (0, 4, 1, 2, 3))


# ---------------------------- parameter creation -----------------------------


def init_mha_params(key, n_hiddens, n_head):
    dk = dv = n_hiddens // n_head
    k1, k2, k3, k4, k5 = jax.random.split(key, 5)
    std = 1.0 / np.sqrt(n_hiddens)
    return dict(
        wq=jax.random.normal(k1, (n_hiddens, n_head * dk), jnp.float32) * std,
        wk=jax.random.normal(k2, (n_hiddens, n_head * dk), jnp.float32) * std,
        wv=jax.random.normal(k3, (n_hiddens, n_head * dv), jnp.float32) * std,
        wfc=jax.random.normal(k4, (n_head * dv, n_hiddens), jnp.float32) * std,
        bfc=jax.random.uniform(k5, (1, n_hiddens), jnp.float32, -std, std),
        n_head=n_head,
        d_k=dk,
        d_v=dv,
    )


# ------------------------------- pure-JAX ref ---------------------------------


def _mha_ref(x5, p, axial_axis):
    B, T, H, W, C = x5.shape
    nh, dk, dv = p["n_head"], p["d_k"], p["d_v"]
    xf = x5.reshape(-1, C)
    q = (xf @ p["wq"]).reshape(B, T, H, W, nh, dk).transpose(0, 4, 1, 2, 3, 5)
    k = (xf @ p["wk"]).reshape(B, T, H, W, nh, dk).transpose(0, 4, 1, 2, 3, 5)
    v = (xf @ p["wv"]).reshape(B, T, H, W, nh, dv).transpose(0, 4, 1, 2, 3, 5)
    perm = [0, 1] + [a for a in (2, 3, 4) if a != axial_axis] + [axial_axis, 5]
    inv = list(np.argsort(perm))
    q, k, v = q.transpose(perm), k.transpose(perm), v.transpose(perm)
    s = jnp.einsum("...ld,...md->...lm", q, k) / np.sqrt(dk)
    a = jax.nn.softmax(s, axis=-1)
    o = jnp.einsum("...lm,...md->...ld", a, v)
    o = o.transpose(inv).transpose(0, 2, 3, 4, 1, 5).reshape(-1, nh * dv)
    return (o @ p["wfc"] + p["bfc"]).reshape(B, T, H, W, C)


def axial_block_ref(x, P):
    x5 = jnp.transpose(x, (0, 2, 3, 4, 1))
    y = (
        _mha_ref(x5, P["attn_w"], 4)
        + _mha_ref(x5, P["attn_h"], 3)
        + _mha_ref(x5, P["attn_t"], 2)
    )
    return jnp.transpose(y, (0, 4, 1, 2, 3))


# ----------------------------------- main -------------------------------------

if __name__ == "__main__":
    key = jax.random.PRNGKey(0)
    kx, kw, kh, kt = jax.random.split(key, 4)

    n_hiddens, n_head = 32, 4
    B, T, H, W = 2, 8, 8, 8

    x = jax.random.normal(kx, (B, n_hiddens, T, H, W), jnp.float32)
    P = dict(
        attn_w=init_mha_params(kw, n_hiddens, n_head),
        attn_h=init_mha_params(kh, n_hiddens, n_head),
        attn_t=init_mha_params(kt, n_hiddens, n_head),
    )

    out = axial_block(x, P)
    out = jax.block_until_ready(out)

    ref = axial_block_ref(x, P)
    assert out.shape == x.shape
    # Exact softmax normalization now -> remaining deltas are pure f32/MXU
    # rounding; 2e-3 (tighter than before) gives comfortable margin.
    np.testing.assert_allclose(np.asarray(out), np.asarray(ref), rtol=2e-3, atol=2e-3)

    print("KERNEL_OK")
</pallas_src>

<mosaic_0001>
module attributes {stable_mosaic.version = 11 : i64} {
  func.func @_qkv_proj_kernel(%arg0: i32, %arg1: memref<128x32xf32, #tpu.memory_space<vmem>>, %arg2: memref<128x32xf32, #tpu.memory_space<vmem>>, %arg3: memref<128x32xf32, #tpu.memory_space<vmem>>, %arg4: memref<32x96xf32, #tpu.memory_space<vmem>>, %arg5: memref<32x96xf32, #tpu.memory_space<vmem>>, %arg6: memref<32x96xf32, #tpu.memory_space<vmem>>, %arg7: memref<128x96xf32, #tpu.memory_space<vmem>>, %arg8: memref<128x96xf32, #tpu.memory_space<vmem>>, %arg9: memref<128x96xf32, #tpu.memory_space<vmem>>) attributes {dimension_semantics = [#tpu.dimension_semantics<parallel>], iteration_bounds = array<i64: 8>, scalar_prefetch = 0 : i64, scratch_operands = 0 : i64, tpu.core_type = #tpu.core_type<tc>, window_params = [{transform_indices = @transform_0, window_bounds = array<i64: 128, 32>}, {transform_indices = @transform_1, window_bounds = array<i64: 128, 32>}, {transform_indices = @transform_2, window_bounds = array<i64: 128, 32>}, {pipeline_mode = #tpu.pipeline_mode<synchronous>, transform_indices = @transform_3, window_bounds = array<i64: 32, 96>}, {pipeline_mode = #tpu.pipeline_mode<synchronous>, transform_indices = @transform_4, window_bounds = array<i64: 32, 96>}, {pipeline_mode = #tpu.pipeline_mode<synchronous>, transform_indices = @transform_5, window_bounds = array<i64: 32, 96>}, {transform_indices = @transform_6, window_bounds = array<i64: 128, 96>}, {transform_indices = @transform_7, window_bounds = array<i64: 128, 96>}, {transform_indices = @transform_8, window_bounds = array<i64: 128, 96>}]} {
    %c0 = arith.constant 0 : index
    %c0_0 = arith.constant 0 : index
    %0 = vector.load %arg1[%c0, %c0_0] : memref<128x32xf32, #tpu.memory_space<vmem>>, vector<128x32xf32>
    %c0_1 = arith.constant 0 : index
    %c0_2 = arith.constant 0 : index
    %1 = vector.load %arg4[%c0_1, %c0_2] : memref<32x96xf32, #tpu.memory_space<vmem>>, vector<32x96xf32>
    %cst = arith.constant dense<0.000000e+00> : vector<128x96xf32>
    %2 = tpu.matmul %0, %1, %cst {dimension_numbers = #tpu.dot_dimension_numbers<[1], [0], [0], [1], [0, 0, 1, 1], [], []>} : vector<128x32xf32>, vector<32x96xf32>, vector<128x96xf32> -> vector<128x96xf32>
    %c0_3 = arith.constant 0 : index
    %c0_4 = arith.constant 0 : index
    %3 = vector.load %arg7[%c0_3, %c0_4] : memref<128x96xf32, #tpu.memory_space<vmem>>, vector<128x96xf32>
    tpu.vector_store %arg7[%c0_3, %c0_4], %2 {strides = array<i32>} : memref<128x96xf32, #tpu.memory_space<vmem>>, vector<128x96xf32>,
    %c0_5 = arith.constant 0 : index
    %c0_6 = arith.constant 0 : index
    %4 = vector.load %arg2[%c0_5, %c0_6] : memref<128x32xf32, #tpu.memory_space<vmem>>, vector<128x32xf32>
    %c0_7 = arith.constant 0 : index
    %c0_8 = arith.constant 0 : index
    %5 = vector.load %arg5[%c0_7, %c0_8] : memref<32x96xf32, #tpu.memory_space<vmem>>, vector<32x96xf32>
    %cst_9 = arith.constant dense<0.000000e+00> : vector<128x96xf32>
    %6 = tpu.matmul %4, %5, %cst_9 {dimension_numbers = #tpu.dot_dimension_numbers<[1], [0], [0], [1], [0, 0, 1, 1], [], []>} : vector<128x32xf32>, vector<32x96xf32>, vector<128x96xf32> -> vector<128x96xf32>
    %c0_10 = arith.constant 0 : index
    %c0_11 = arith.constant 0 : index
    %7 = vector.load %arg8[%c0_10, %c0_11] : memref<128x96xf32, #tpu.memory_space<vmem>>, vector<128x96xf32>
    tpu.vector_store %arg8[%c0_10, %c0_11], %6 {strides = array<i32>} : memref<128x96xf32, #tpu.memory_space<vmem>>, vector<128x96xf32>,
    %c0_12 = arith.constant 0 : index
    %c0_13 = arith.constant 0 : index
    %8 = vector.load %arg3[%c0_12, %c0_13] : memref<128x32xf32, #tpu.memory_space<vmem>>, vector<128x32xf32>
    %c0_14 = arith.constant 0 : index
    %c0_15 = arith.constant 0 : index
    %9 = vector.load %arg6[%c0_14, %c0_15] : memref<32x96xf32, #tpu.memory_space<vmem>>, vector<32x96xf32>
    %cst_16 = arith.constant dense<0.000000e+00> : vector<128x96xf32>
    %10 = tpu.matmul %8, %9, %cst_16 {dimension_numbers = #tpu.dot_dimension_numbers<[1], [0], [0], [1], [0, 0, 1, 1], [], []>} : vector<128x32xf32>, vector<32x96xf32>, vector<128x96xf32> -> vector<128x96xf32>
    %c0_17 = arith.constant 0 : index
    %c0_18 = arith.constant 0 : index
    %11 = vector.load %arg9[%c0_17, %c0_18] : memref<128x96xf32, #tpu.memory_space<vmem>>, vector<128x96xf32>
    tpu.vector_store %arg9[%c0_17, %c0_18], %10 {strides = array<i32>} : memref<128x96xf32, #tpu.memory_space<vmem>>, vector<128x96xf32>,
    return
  }
  func.func @transform_0(%arg0: i32) -> (i32, i32) {
    %c0_i32 = arith.constant 0 : i32
    %c0_i32_0 = arith.constant 0 : i32
    return %arg0, %c0_i32 : i32, i32
  }
  func.func @transform_1(%arg0: i32) -> (i32, i32) {
    %c0_i32 = arith.constant 0 : i32
    %c0_i32_0 = arith.constant 0 : i32
    return %arg0, %c0_i32 : i32, i32
  }
  func.func @transform_2(%arg0: i32) -> (i32, i32) {
    %c0_i32 = arith.constant 0 : i32
    %c0_i32_0 = arith.constant 0 : i32
    return %arg0, %c0_i32 : i32, i32
  }
  func.func @transform_3(%arg0: i32) -> (i32, i32) {
    %c0_i32 = arith.constant 0 : i32
    %c0_i32_0 = arith.constant 0 : i32
    %c0_i32_1 = arith.constant 0 : i32
    return %c0_i32, %c0_i32_0 : i32, i32
  }
  func.func @transform_4(%arg0: i32) -> (i32, i32) {
    %c0_i32 = arith.constant 0 : i32
    %c0_i32_0 = arith.constant 0 : i32
    %c0_i32_1 = arith.constant 0 : i32
    return %c0_i32, %c0_i32_0 : i32, i32
  }
  func.func @transform_5(%arg0: i32) -> (i32, i32) {
    %c0_i32 = arith.constant 0 : i32
    %c0_i32_0 = arith.constant 0 : i32
    %c0_i32_1 = arith.constant 0 : i32
    return %c0_i32, %c0_i32_0 : i32, i32
  }
  func.func @transform_6(%arg0: i32) -> (i32, i32) {
    %c0_i32 = arith.constant 0 : i32
    %c0_i32_0 = arith.constant 0 : i32
    return %arg0, %c0_i32 : i32, i32
  }
  func.func @transform_7(%arg0: i32) -> (i32, i32) {
    %c0_i32 = arith.constant 0 : i32
    %c0_i32_0 = arith.constant 0 : i32
    return %arg0, %c0_i32 : i32, i32
  }
  func.func @transform_8(%arg0: i32) -> (i32, i32) {
    %c0_i32 = arith.constant 0 : i32
    %c0_i32_0 = arith.constant 0 : i32
    return %arg0, %c0_i32 : i32, i32
  }
}

</mosaic_0001>

<bundles_post_ra>
// kernel: tpu_custom_call.1
= control target key start
LH: loop header
LB: loop body
LE: loop exit
PB: predicated region body
PF: predicated region fallthrough
CT: control target
= control target key end

     0   :  { %s1509_s27 = smov 0   ;;  %s1786_s0 = inlined_call_operand.vmem [shape: f32[1024,32], index: 0, kind: input, shape index: {}]   ;;  %s1787_s1 = inlined_call_operand.vmem [shape: f32[1024,32], index: 1, kind: input, shape index: {}]   ;;  %s1788_s2 = inlined_call_operand.vmem [shape: f32[1024,32], index: 2, kind: input, shape index: {}]   ;;  %s1789_s3 = inlined_call_operand.vmem [shape: f32[32,96], index: 3, kind: input, shape index: {}]   ;;  %s1790_s4 = inlined_call_operand.vmem [shape: f32[32,96], index: 4, kind: input, shape index: {}]   ;;  %s1791_s5 = inlined_call_operand.vmem [shape: f32[32,96], index: 5, kind: input, shape index: {}]   ;;  %s1792_s6 = inlined_call_operand.vmem [shape: f32[1024,96], index: 6, kind: output, shape index: {0}]   ;;  %s1793_s7 = inlined_call_operand.vmem [shape: f32[1024,96], index: 7, kind: output, shape index: {1}]   ;;  %s1794_s8 = inlined_call_operand.vmem [shape: f32[1024,96], index: 8, kind: output, shape index: {2}]  }
   0x1 LB: > { %s1217_s28 = sadd.s32 4294967295, %s1462_s27   ;;  %p1221_p0 = scmp.ge.s32.totalorder %s1462_s27, 1  ;;  %s1462_s27 = sphi %s1509_s27, %s19_s27  }
   0x2   : > { %p290_p1 = scmp.lt.s32.totalorder %s1462_s27, 9 }
   0x4   : > { %p291_p2 = pnand %p1221_p0, %p290_p1 }
   0x5   : > { %s1222_s11 = sshll.u32 (!%p291_p2), %s1217_s28, 4 }
   0x6   : > { %294 = sbr.rel (%p291_p2) target bundleno = 261 (0x105), region = 44  ;;  %p345_p3 = scmp.lt.s32.totalorder (!%p291_p2), %s1222_s11, 127 }
   0xb   : > { %v399_v0 = vld [vmem:[%s1789_s3 + $0x18] sm:$0xff]  ;;  %v398_v1 = vld [vmem:[%s1789_s3 + $0x10] sm:$0xff]  ;;  %v397_v2 = vld [vmem:[%s1789_s3 + $0x8] sm:$0xff]  ;;  %s1796_s11 = smov (!%p345_p3, %s1222_s11), 127  ;;  %vm400_vm0 = vcmask 261120   ;;  %vm594_vm1 = vcmask 785408  }
   0xc   : > { %1344 = vmatprep.subr.mxu0 %v399_v0  ;;  %1440 = vmatprep.subr.mxu1 %v399_v0  ;;  %v396_v3 = vld [vmem:[%s1789_s3] sm:$0xff]  ;;  %s1529_s16 = sshll.u32 %s1796_s11, 3  ;;  %v630_v8 = vld [vmem:[%s1790_s4 + $0x18] sm:$0xff]  ;;  %v629_v14 = vld [vmem:[%s1790_s4 + $0x10] sm:$0xff] }
   0xd   : > { %1345 = vmatpush3.msra.mxu0 %v399_v0  ;;  %1444 = vmatpush3.msra.mxu1 %v399_v0  ;;  %s1535_s19 = scalar_lea.vmem %s1786_s0, %s1529_s16  ;;  %v859_v9 = vld [vmem:[%s1791_s5 + $0x18] sm:$0xff]  ;;  %v858_v15 = vld [vmem:[%s1791_s5 + $0x10] sm:$0xff]  ;;  %v628_v20 = vld [vmem:[%s1790_s4 + $0x8] sm:$0xff]  ;;  %s1587_s13 = scalar_lea.vmem %s1787_s1, %s1529_s16 }
   0xe   : > { %1346 = vmatprep.subr.mxu0 %v398_v1  ;;  %1441 = vmatprep.subr.mxu1 %v398_v1  ;;  %v380_v4 = vld [vmem:[%s1535_s19] sm:$0xff]  ;;  %v381_v6 = vld [vmem:[%s1535_s19 + $0x8] sm:$0xff]  ;;  %v382_v10 = vld [vmem:[%s1535_s19 + $0x10] sm:$0xff]  ;;  %s1593_s17 = scalar_lea.vmem %s1788_s2, %s1529_s16  ;;  %s1673_s24 = scalar_lea.vmem %s1792_s6, %s1529_s16 }
   0xf   : > { %1347 = vmatpush3.msra.mxu0 %v398_v1  ;;  %1445 = vmatpush3.msra.mxu1 %v398_v1  ;;  %v388_v5 = vld [vmem:[%s1535_s19 + $0x40] sm:$0xff]  ;;  %v389_v7 = vld [vmem:[%s1535_s19 + $0x48] sm:$0xff]  ;;  %v390_v11 = vld [vmem:[%s1535_s19 + $0x50] sm:$0xff]  ;;  %s1707_s28 = scalar_lea.vmem %s1793_s7, %s1529_s16  ;;  %s1713_s9 = scalar_lea.vmem %s1794_s8, %s1529_s16 }
  0x10   : > { %1348 = vmatprep.subr.mxu0 %v397_v2  ;;  %1442 = vmatprep.subr.mxu1 %v397_v2  ;;  %v383_v12 = vld [vmem:[%s1535_s19 + $0x18] sm:$0xff]  ;;  %v384_v16 = vld [vmem:[%s1535_s19 + $0x20] sm:$0xff]  ;;  %v385_v18 = vld [vmem:[%s1535_s19 + $0x28] sm:$0xff] }
  0x11   : > { %1349 = vmatpush3.msra.mxu0 %v397_v2  ;;  %1446 = vmatpush3.msra.mxu1 %v397_v2  ;;  %v391_v13 = vld [vmem:[%s1535_s19 + $0x58] sm:$0xff]  ;;  %v392_v17 = vld [vmem:[%s1535_s19 + $0x60] sm:$0xff]  ;;  %v393_v19 = vld [vmem:[%s1535_s19 + $0x68] sm:$0xff] }
  0x12   : > { %1350 = vmatprep.subr.mxu0 %v396_v3  ;;  %1443 = vmatprep.subr.mxu1 %v396_v3  ;;  %v857_v21 = vld [vmem:[%s1791_s5 + $0x8] sm:$0xff]  ;;  %v386_v22 = vld [vmem:[%s1535_s19 + $0x30] sm:$0xff]  ;;  %v387_v24 = vld [vmem:[%s1535_s19 + $0x38] sm:$0xff] }
  0x13   : > { %1351 = vmatpush3.msra.mxu0 %v396_v3  ;;  %1447 = vmatpush3.msra.mxu1 %v396_v3  ;;  %v394_v23 = vld [vmem:[%s1535_s19 + $0x70] sm:$0xff]  ;;  %v395_v25 = vld [vmem:[%s1535_s19 + $0x78] sm:$0xff]  ;;  %v627_v26 = vld [vmem:[%s1790_s4] sm:$0xff] }
  0x14   : > { %1352 = vmatprep.mubr.msk.f32.mxu0 %vm400_vm0, %v380_v4  ;;  %1364 = vmatprep.mubr.msk.f32.mxu1 %vm400_vm0, %v388_v5  ;;  %v856_v27 = vld [vmem:[%s1791_s5] sm:$0xff]  ;;  %v612_v30 = vld [vmem:[%s1587_s13 + $0x8] sm:$0xff]  ;;  %v613_v32 = vld [vmem:[%s1587_s13 + $0x10] sm:$0xff] }
  0x15   : > { %1353 = vmatmul.mubr.msk.f32.vlgmr.msra.gmra.mxu0 %vm400_vm0, %v381_v6  ;;  %1365 = vmatmul.mubr.msk.f32.vlgmr.msra.gmra.mxu1 %vm400_vm0, %v389_v7  ;;  %v611_v28 = vld [vmem:[%s1587_s13] sm:$0xff]  ;;  %v841_v31 = vld [vmem:[%s1593_s17 + $0x8] sm:$0xff]  ;;  %v842_v33 = vld [vmem:[%s1593_s17 + $0x10] sm:$0xff] }
  0x16   : > { %1376 = vmatprep.subr.mxu1 %v630_v8  ;;  %1408 = vmatprep.subr.mxu0 %v859_v9  ;;  %v840_v29 = vld [vmem:[%s1593_s17] sm:$0xff]  ;;  %v614_v34 = vld [vmem:[%s1587_s13 + $0x18] sm:$0xff]  ;;  %v616_v38 = vld [vmem:[%s1587_s13 + $0x28] sm:$0xff] }
  0x17   : > { %1377 = vmatpush3.msra.mxu1 %v630_v8  ;;  %1409 = vmatpush3.msra.mxu0 %v859_v9  ;;  %v843_v35 = vld [vmem:[%s1593_s17 + $0x18] sm:$0xff]  ;;  %v615_v36 = vld [vmem:[%s1587_s13 + $0x20] sm:$0xff]  ;;  %v845_v39 = vld [vmem:[%s1593_s17 + $0x28] sm:$0xff] }
  0x18   : > { %1355 = vmatprep.mubr.msk.f32.mxu0 %vm400_vm0, %v382_v10  ;;  %1367 = vmatprep.mubr.msk.f32.mxu1 %vm400_vm0, %v390_v11  ;;  %v844_v37 = vld [vmem:[%s1593_s17 + $0x20] sm:$0xff]  ;;  %v617_v40 = vld [vmem:[%s1587_s13 + $0x30] sm:$0xff]  ;;  %v618_v42 = vld [vmem:[%s1587_s13 + $0x38] sm:$0xff] }
  0x19   : > { %1356 = vmatmul.mubr.msk.f32.gmra.mxu0 %vm400_vm0, %v383_v12  ;;  %1368 = vmatmul.mubr.msk.f32.gmra.mxu1 %vm400_vm0, %v391_v13  ;;  %v846_v41 = vld [vmem:[%s1593_s17 + $0x30] sm:$0xff]  ;;  %v847_v43 = vld [vmem:[%s1593_s17 + $0x38] sm:$0xff]  ;;  %v619_v44 = vld [vmem:[%s1587_s13 + $0x40] sm:$0xff] }
  0x1a   : > { %1378 = vmatprep.subr.mxu1 %v629_v14  ;;  %1410 = vmatprep.subr.mxu0 %v858_v15  ;;  %v848_v45 = vld [vmem:[%s1593_s17 + $0x40] sm:$0xff]  ;;  %v620_v46 = vld [vmem:[%s1587_s13 + $0x48] sm:$0xff]  ;;  %v621_v48 = vld [vmem:[%s1587_s13 + $0x50] sm:$0xff] }
  0x1b   : > { %1379 = vmatpush3.msra.mxu1 %v629_v14  ;;  %1411 = vmatpush3.msra.mxu0 %v858_v15  ;;  %v849_v47 = vld [vmem:[%s1593_s17 + $0x48] sm:$0xff]  ;;  %v850_v49 = vld [vmem:[%s1593_s17 + $0x50] sm:$0xff]  ;;  %v622_v50 = vld [vmem:[%s1587_s13 + $0x58] sm:$0xff] }
  0x1c   : > { %1358 = vmatprep.mubr.msk.f32.mxu0 %vm400_vm0, %v384_v16  ;;  %1370 = vmatprep.mubr.msk.f32.mxu1 %vm400_vm0, %v392_v17  ;;  %v851_v51 = vld [vmem:[%s1593_s17 + $0x58] sm:$0xff]  ;;  %v623_v52 = vld [vmem:[%s1587_s13 + $0x60] sm:$0xff]  ;;  %v624_v54 = vld [vmem:[%s1587_s13 + $0x68] sm:$0xff] }
  0x1d   : > { %1359 = vmatmul.mubr.msk.f32.gmra.mxu0 %vm400_vm0, %v385_v18  ;;  %1371 = vmatmul.mubr.msk.f32.gmra.mxu1 %vm400_vm0, %v393_v19  ;;  %v852_v53 = vld [vmem:[%s1593_s17 + $0x60] sm:$0xff]  ;;  %v853_v55 = vld [vmem:[%s1593_s17 + $0x68] sm:$0xff]  ;;  %v625_v56 = vld [vmem:[%s1587_s13 + $0x70] sm:$0xff] }
  0x1e   : > { %1380 = vmatprep.subr.mxu1 %v628_v20  ;;  %1412 = vmatprep.subr.mxu0 %v857_v21  ;;  %v854_v57 = vld [vmem:[%s1593_s17 + $0x70] sm:$0xff]  ;;  %v626_v58 = vld [vmem:[%s1587_s13 + $0x78] sm:$0xff] }
  0x1f   : > { %1381 = vmatpush3.msra.mxu1 %v628_v20  ;;  %1413 = vmatpush3.msra.mxu0 %v857_v21  ;;  %v855_v59 = vld [vmem:[%s1593_s17 + $0x78] sm:$0xff] }
  0x20   : > { %1361 = vmatprep.mubr.msk.f32.mxu0 %vm400_vm0, %v386_v22  ;;  %1373 = vmatprep.mubr.msk.f32.mxu1 %vm400_vm0, %v394_v23 }
  0x21   : > { %1362 = vmatmul.mubr.msk.f32.gmra.mxu0 %vm400_vm0, %v387_v24  ;;  %1374 = vmatmul.mubr.msk.f32.gmra.mxu1 %vm400_vm0, %v395_v25 }
  0x22   : > { %1382 = vmatprep.subr.mxu1 %v627_v26  ;;  %1414 = vmatprep.subr.mxu0 %v856_v27 }
  0x23   : > { %1383 = vmatpush3.msra.mxu1 %v627_v26  ;;  %1415 = vmatpush3.msra.mxu0 %v856_v27 }
  0x24   : > { %1384 = vmatprep.mubr.msk.f32.mxu1 %vm400_vm0, %v611_v28  ;;  %1416 = vmatprep.mubr.msk.f32.mxu0 %vm400_vm0, %v840_v29 }
  0x25   : > { %1385 = vmatmul.mubr.msk.f32.vlgmr.msra.gmra.mxu1 %vm400_vm0, %v612_v30  ;;  %1417 = vmatmul.mubr.msk.f32.vlgmr.msra.gmra.mxu0 %vm400_vm0, %v841_v31 }
  0x26   : > { %1387 = vmatprep.mubr.msk.f32.mxu1 %vm400_vm0, %v613_v32  ;;  %1419 = vmatprep.mubr.msk.f32.mxu0 %vm400_vm0, %v842_v33 }
  0x29   : > { %1388 = vmatmul.mubr.msk.f32.gmra.mxu1 %vm400_vm0, %v614_v34  ;;  %1420 = vmatmul.mubr.msk.f32.gmra.mxu0 %vm400_vm0, %v843_v35 }
  0x2a   : > { %1390 = vmatprep.mubr.msk.f32.mxu1 %vm400_vm0, %v615_v36  ;;  %1422 = vmatprep.mubr.msk.f32.mxu0 %vm400_vm0, %v844_v37 }
  0x2d   : > { %1391 = vmatmul.mubr.msk.f32.gmra.mxu1 %vm400_vm0, %v616_v38  ;;  %1423 = vmatmul.mubr.msk.f32.gmra.mxu0 %vm400_vm0, %v845_v39 }
  0x2e   : > { %1393 = vmatprep.mubr.msk.f32.mxu1 %vm400_vm0, %v617_v40  ;;  %1425 = vmatprep.mubr.msk.f32.mxu0 %vm400_vm0, %v846_v41 }
  0x31   : > { %1394 = vmatmul.mubr.msk.f32.gmra.mxu1 %vm400_vm0, %v618_v42  ;;  %1426 = vmatmul.mubr.msk.f32.gmra.mxu0 %vm400_vm0, %v847_v43 }
  0x32   : > { %1396 = vmatprep.mubr.msk.f32.mxu1 %vm400_vm0, %v619_v44  ;;  %1428 = vmatprep.mubr.msk.f32.mxu0 %vm400_vm0, %v848_v45 }
  0x35   : > { %1397 = vmatmul.mubr.msk.f32.gmra.mxu1 %vm400_vm0, %v620_v46  ;;  %1429 = vmatmul.mubr.msk.f32.gmra.mxu0 %vm400_vm0, %v849_v47 }
  0x36   : > { %1399 = vmatprep.mubr.msk.f32.mxu1 %vm400_vm0, %v621_v48  ;;  %1431 = vmatprep.mubr.msk.f32.mxu0 %vm400_vm0, %v850_v49 }
  0x39   : > { %1400 = vmatmul.mubr.msk.f32.gmra.mxu1 %vm400_vm0, %v622_v50  ;;  %1432 = vmatmul.mubr.msk.f32.gmra.mxu0 %vm400_vm0, %v851_v51 }
  0x3a   : > { %1402 = vmatprep.mubr.msk.f32.mxu1 %vm400_vm0, %v623_v52  ;;  %1434 = vmatprep.mubr.msk.f32.mxu0 %vm400_vm0, %v852_v53 }
  0x3d   : > { %1403 = vmatmul.mubr.msk.f32.gmra.mxu1 %vm400_vm0, %v624_v54  ;;  %1435 = vmatmul.mubr.msk.f32.gmra.mxu0 %vm400_vm0, %v853_v55 }
  0x3e   : > { %1405 = vmatprep.mubr.msk.f32.mxu1 %vm400_vm0, %v625_v56  ;;  %1437 = vmatprep.mubr.msk.f32.mxu0 %vm400_vm0, %v854_v57 }
  0x41   : > { %1406 = vmatmul.mubr.msk.f32.gmra.mxu1 %vm400_vm0, %v626_v58  ;;  %1438 = vmatmul.mubr.msk.f32.gmra.mxu0 %vm400_vm0, %v855_v59 }
  0xd5   : > { %v1354_v60 = vpop.f32.mrf.mxu0  ;;  %v1366_v61 = vpop.f32.mrf.mxu1 }
  0xd6   : > { %596 = vst.msk [vmem:[%s1673_s24 + $0x8] sm:$0xff] %vm594_vm1, %v1354_v60  ;;  %604 = vst.msk [vmem:[%s1673_s24 + $0x48] sm:$0xff] %vm594_vm1, %v1366_v61 }
  0xd7   : > { %v515_v62 = vpop.f32.mrf.mxu0  ;;  %v555_v63 = vpop.f32.mrf.mxu1 }
  0xd8   : > { %595 = vst.msk [vmem:[%s1673_s24] sm:$0xff] %vm594_vm1, %v515_v62  ;;  %603 = vst.msk [vmem:[%s1673_s24 + $0x40] sm:$0xff] %vm594_vm1, %v555_v63 }
  0xd9   : > { %v1357_v0 = vpop.f32.mrf.mxu0  ;;  %v1369_v1 = vpop.f32.mrf.mxu1 }
  0xda   : > { %598 = vst.msk [vmem:[%s1673_s24 + $0x18] sm:$0xff] %vm594_vm1, %v1357_v0  ;;  %606 = vst.msk [vmem:[%s1673_s24 + $0x58] sm:$0xff] %vm594_vm1, %v1369_v1 }
  0xdb   : > { %v525_v2 = vpop.f32.mrf.mxu0  ;;  %v565_v3 = vpop.f32.mrf.mxu1 }
  0xdc   : > { %597 = vst.msk [vmem:[%s1673_s24 + $0x10] sm:$0xff] %vm594_vm1, %v525_v2  ;;  %605 = vst.msk [vmem:[%s1673_s24 + $0x50] sm:$0xff] %vm594_vm1, %v565_v3 }
  0xdd   : > { %v1360_v4 = vpop.f32.mrf.mxu0  ;;  %v1372_v5 = vpop.f32.mrf.mxu1 }
  0xde   : > { %600 = vst.msk [vmem:[%s1673_s24 + $0x28] sm:$0xff] %vm594_vm1, %v1360_v4  ;;  %608 = vst.msk [vmem:[%s1673_s24 + $0x68] sm:$0xff] %vm594_vm1, %v1372_v5 }
  0xdf   : > { %v535_v6 = vpop.f32.mrf.mxu0  ;;  %v575_v7 = vpop.f32.mrf.mxu1 }
  0xe0   : > { %599 = vst.msk [vmem:[%s1673_s24 + $0x20] sm:$0xff] %vm594_vm1, %v535_v6  ;;  %607 = vst.msk [vmem:[%s1673_s24 + $0x60] sm:$0xff] %vm594_vm1, %v575_v7 }
  0xe1   : > { %v1363_v8 = vpop.f32.mrf.mxu0  ;;  %v1375_v9 = vpop.f32.mrf.mxu1 }
  0xe2   : > { %602 = vst.msk [vmem:[%s1673_s24 + $0x38] sm:$0xff] %vm594_vm1, %v1363_v8  ;;  %610 = vst.msk [vmem:[%s1673_s24 + $0x78] sm:$0xff] %vm594_vm1, %v1375_v9 }
  0xe3   : > { %v545_v10 = vpop.f32.mrf.mxu0  ;;  %v585_v11 = vpop.f32.mrf.mxu1 }
  0xe4   : > { %601 = vst.msk [vmem:[%s1673_s24 + $0x30] sm:$0xff] %vm594_vm1, %v545_v10  ;;  %609 = vst.msk [vmem:[%s1673_s24 + $0x70] sm:$0xff] %vm594_vm1, %v585_v11 }
  0xe5   : > { %v1386_v12 = vpop.f32.mrf.mxu1  ;;  %v1418_v13 = vpop.f32.mrf.mxu0 }
  0xe6   : > { %825 = vst.msk [vmem:[%s1707_s28 + $0x8] sm:$0xff] %vm594_vm1, %v1386_v12  ;;  %1054 = vst.msk [vmem:[%s1713_s9 + $0x8] sm:$0xff] %vm594_vm1, %v1418_v13 }
  0xe7   : > { %v745_v14 = vpop.f32.mrf.mxu1  ;;  %v974_v15 = vpop.f32.mrf.mxu0 }
  0xe8   : > { %824 = vst.msk [vmem:[%s1707_s28] sm:$0xff] %vm594_vm1, %v745_v14  ;;  %1053 = vst.msk [vmem:[%s1713_s9] sm:$0xff] %vm594_vm1, %v974_v15 }
  0xe9   : > { %v1389_v16 = vpop.f32.mrf.mxu1  ;;  %v1421_v17 = vpop.f32.mrf.mxu0 }
  0xea   : > { %827 = vst.msk [vmem:[%s1707_s28 + $0x18] sm:$0xff] %vm594_vm1, %v1389_v16  ;;  %1056 = vst.msk [vmem:[%s1713_s9 + $0x18] sm:$0xff] %vm594_vm1, %v1421_v17 }
  0xeb   : > { %v755_v18 = vpop.f32.mrf.mxu1  ;;  %v984_v19 = vpop.f32.mrf.mxu0 }
  0xec   : > { %826 = vst.msk [vmem:[%s1707_s28 + $0x10] sm:$0xff] %vm594_vm1, %v755_v18  ;;  %1055 = vst.msk [vmem:[%s1713_s9 + $0x10] sm:$0xff] %vm594_vm1, %v984_v19 }
  0xed   : > { %v1392_v20 = vpop.f32.mrf.mxu1  ;;  %v1424_v21 = vpop.f32.mrf.mxu0 }
  0xee   : > { %829 = vst.msk [vmem:[%s1707_s28 + $0x28] sm:$0xff] %vm594_vm1, %v1392_v20  ;;  %1058 = vst.msk [vmem:[%s1713_s9 + $0x28] sm:$0xff] %vm594_vm1, %v1424_v21 }
  0xef   : > { %v765_v22 = vpop.f32.mrf.mxu1  ;;  %v994_v23 = vpop.f32.mrf.mxu0 }
  0xf0   : > { %828 = vst.msk [vmem:[%s1707_s28 + $0x20] sm:$0xff] %vm594_vm1, %v765_v22  ;;  %1057 = vst.msk [vmem:[%s1713_s9 + $0x20] sm:$0xff] %vm594_vm1, %v994_v23 }
  0xf1   : > { %v1395_v24 = vpop.f32.mrf.mxu1  ;;  %v1427_v25 = vpop.f32.mrf.mxu0 }
  0xf2   : > { %831 = vst.msk [vmem:[%s1707_s28 + $0x38] sm:$0xff] %vm594_vm1, %v1395_v24  ;;  %1060 = vst.msk [vmem:[%s1713_s9 + $0x38] sm:$0xff] %vm594_vm1, %v1427_v25 }
  0xf3   : > { %v775_v26 = vpop.f32.mrf.mxu1  ;;  %v1004_v27 = vpop.f32.mrf.mxu0 }
  0xf4   : > { %830 = vst.msk [vmem:[%s1707_s28 + $0x30] sm:$0xff] %vm594_vm1, %v775_v26  ;;  %1059 = vst.msk [vmem:[%s1713_s9 + $0x30] sm:$0xff] %vm594_vm1, %v1004_v27 }
  0xf5   : > { %v1398_v28 = vpop.f32.mrf.mxu1  ;;  %v1430_v29 = vpop.f32.mrf.mxu0 }
  0xf6   : > { %833 = vst.msk [vmem:[%s1707_s28 + $0x48] sm:$0xff] %vm594_vm1, %v1398_v28  ;;  %1062 = vst.msk [vmem:[%s1713_s9 + $0x48] sm:$0xff] %vm594_vm1, %v1430_v29 }
  0xf7   : > { %v785_v30 = vpop.f32.mrf.mxu1  ;;  %v1014_v31 = vpop.f32.mrf.mxu0 }
  0xf8   : > { %832 = vst.msk [vmem:[%s1707_s28 + $0x40] sm:$0xff] %vm594_vm1, %v785_v30  ;;  %1061 = vst.msk [vmem:[%s1713_s9 + $0x40] sm:$0xff] %vm594_vm1, %v1014_v31 }
  0xf9   : > { %v1401_v32 = vpop.f32.mrf.mxu1  ;;  %v1433_v33 = vpop.f32.mrf.mxu0 }
  0xfa   : > { %835 = vst.msk [vmem:[%s1707_s28 + $0x58] sm:$0xff] %vm594_vm1, %v1401_v32  ;;  %1064 = vst.msk [vmem:[%s1713_s9 + $0x58] sm:$0xff] %vm594_vm1, %v1433_v33 }
  0xfb   : > { %v795_v34 = vpop.f32.mrf.mxu1  ;;  %v1024_v35 = vpop.f32.mrf.mxu0 }
  0xfc   : > { %834 = vst.msk [vmem:[%s1707_s28 + $0x50] sm:$0xff] %vm594_vm1, %v795_v34  ;;  %1063 = vst.msk [vmem:[%s1713_s9 + $0x50] sm:$0xff] %vm594_vm1, %v1024_v35 }
  0xfd   : > { %v1404_v36 = vpop.f32.mrf.mxu1  ;;  %v1436_v37 = vpop.f32.mrf.mxu0 }
  0xfe   : > { %837 = vst.msk [vmem:[%s1707_s28 + $0x68] sm:$0xff] %vm594_vm1, %v1404_v36  ;;  %1066 = vst.msk [vmem:[%s1713_s9 + $0x68] sm:$0xff] %vm594_vm1, %v1436_v37 }
  0xff   : > { %v805_v38 = vpop.f32.mrf.mxu1  ;;  %v1034_v39 = vpop.f32.mrf.mxu0 }
 0x100   : > { %836 = vst.msk [vmem:[%s1707_s28 + $0x60] sm:$0xff] %vm594_vm1, %v805_v38  ;;  %1065 = vst.msk [vmem:[%s1713_s9 + $0x60] sm:$0xff] %vm594_vm1, %v1034_v39 }
 0x101   : > { %v1407_v40 = vpop.f32.mrf.mxu1  ;;  %v1439_v41 = vpop.f32.mrf.mxu0 }
 0x102   : > { %839 = vst.msk [vmem:[%s1707_s28 + $0x78] sm:$0xff] %vm594_vm1, %v1407_v40  ;;  %1068 = vst.msk [vmem:[%s1713_s9 + $0x78] sm:$0xff] %vm594_vm1, %v1439_v41 }
 0x103   : > { %v815_v42 = vpop.f32.mrf.mxu1  ;;  %v1044_v43 = vpop.f32.mrf.mxu0 }
 0x104   : > { %838 = vst.msk [vmem:[%s1707_s28 + $0x70] sm:$0xff] %vm594_vm1, %v815_v42  ;;  %1067 = vst.msk [vmem:[%s1713_s9 + $0x70] sm:$0xff] %vm594_vm1, %v1044_v43 }
 0x105 PF: > { %s19_s27 = sadd.s32 1, %s1462_s27  }
 0x106   : > { %p16_p4 = scmp.ge.s32.totalorder %s19_s27, 10  }
 0x108   :  { %18 = sbr.rel (!%p16_p4) target bundleno = 1 (0x1), region = 104 }

</bundles_post_ra>
